<compile_context>
chip_gen: v7x
topology: tpu7x:2x2x1
jax: 0.10.0
libtpu: 0.0.40
codegen_flags: <defaults>
</compile_context>

<pallas_src>
import functools

import jax
import jax.numpy as jnp
from jax.experimental import pallas as pl
from jax.experimental.pallas import tpu as pltpu

NODE_TILE = 1024   # target lane-tile width along the node axis (multiple of 128)


def _sids_kernel(x_ref, node_ref, wts_ref, bts_ref, w1_ref, b1_ref,
                 w2_ref, b2_ref, wreg_ref, wregw2_ref, creg_ref,
                 pred_ref, h_ref, *, num_layer, compute_dtype):
    """One grid step = (one node lane-tile, one batch element).

    x_ref    : (1, L, TN)  history (channels = L time steps), compute_dtype
    node_ref : (D, TN)     node embedding^T (batch-invariant), f32
    wts_ref  : (E, L)      time_series_emb_layer weight, compute_dtype
    bts_ref  : (E, 1)      its bias, f32
    w1/b1/w2/b2 : stacked MLP weights (compute_dtype) / biases (f32)
    wreg_ref : (1, H)      regression weight, compute_dtype
    wregw2_ref : (1, H)    wreg @ w2[-1]  (regression folded into last layer)
    creg_ref : (1, 1)      wreg @ b2[-1] + breg, f32
    pred_ref : (1, 1, TN)  output
    h_ref    : (H, TN)     f32 VMEM scratch for the residual stream
    """
    cd = compute_dtype
    x = x_ref[0]                                   # [L, TN]
    node = node_ref[...]                           # [D, TN] f32

    # time_series_emb_layer : Conv2d(L -> E, 1x1)  ==  W_ts @ x + b_ts
    ts = jnp.dot(wts_ref[...], x, preferred_element_type=jnp.float32)
    ts = ts + bts_ref[...]                         # [E, TN] (lane-broadcast add)

    # hidden = concat([time_series_emb, node_emb]) along channels, written
    # straight into the VMEM scratch (E, D are multiples of 8 -> aligned).
    E = ts.shape[0]
    h_ref[:E, :] = ts
    h_ref[E:, :] = node

    # encoder: MultiLayerPerceptron stack, fc2(relu(fc1(h))) + h
    # (dropout = identity in eval mode)
    for l in range(num_layer):
        h = h_ref[...]                             # [H, TN] f32 residual stream
        z = jnp.dot(w1_ref[l], h.astype(cd),
                    preferred_element_type=jnp.float32) + b1_ref[l]
        z = jnp.maximum(z, 0.0)                    # ReLU
        if l + 1 < num_layer:
            h_ref[...] = (jnp.dot(w2_ref[l], z.astype(cd),
                                  preferred_element_type=jnp.float32)
                          + b2_ref[l] + h)
        else:
            # regression_layer folded into the last MLP layer:
            #   pred = wreg @ (w2 z + b2 + h) + breg
            #        = (wreg @ w2) z + wreg @ h + (wreg @ b2 + breg)
            pred = (jnp.dot(wregw2_ref[...], z.astype(cd),
                            preferred_element_type=jnp.float32)
                    + jnp.dot(wreg_ref[...], h.astype(cd),
                              preferred_element_type=jnp.float32)
                    + creg_ref[...])               # [1, TN]
            pred_ref[0] = pred.astype(pred_ref.dtype)


def sids_forward(history_data, params, *, num_layer, return_matrix=True,
                 node_tile=NODE_TILE, compute_dtype=jnp.float32):
    """history_data: [B, L, N, C] (only channel 0 is used, input_dim = 1)."""
    assert num_layer >= 1
    assert node_tile % 128 == 0
    B, L, N, _ = history_data.shape
    x = history_data[..., 0].astype(jnp.float32)       # [B, L, N]

    node_emb = params["node_emb"]                       # [N, D]
    D = node_emb.shape[1]
    wts, bts = params["wts"], params["bts"]             # [E, L], [E, 1]
    E = wts.shape[0]
    H = E + D
    w1, b1 = params["w1"], params["b1"]                 # [nl, H, H], [nl, H, 1]
    w2, b2 = params["w2"], params["b2"]
    wreg, breg = params["wreg"], params["breg"]         # [1, H], [1, 1]

    # Fold the regression 1x1 conv into the last MLP layer (removes the last
    # [H,H]@[H,TN] matmul).  Highest precision for parity with f32 reference.
    hi = jax.lax.Precision.HIGHEST
    wreg_w2 = jnp.dot(wreg, w2[num_layer - 1], precision=hi)      # [1, H]
    creg = jnp.dot(wreg, b2[num_layer - 1], precision=hi) + breg  # [1, 1]

    # ---- node-axis tiling; batch is a separate (inner) grid axis so node
    #      data is fetched once per node tile and never replicated per batch.
    tile_n = min(node_tile, pl.cdiv(N, 128) * 128)
    n_tiles = pl.cdiv(N, tile_n)
    N_pad = n_tiles * tile_n
    pad = N_pad - N

    node_t = node_emb.T.astype(jnp.float32)             # [D, N]
    if pad:
        x = jnp.pad(x, ((0, 0), (0, 0), (0, pad)))
        node_t = jnp.pad(node_t, ((0, 0), (0, pad)))

    cd = compute_dtype
    x_cd = x.astype(cd)
    wts_cd = wts.astype(cd)
    w1_cd = w1.astype(cd)
    w2_cd = w2.astype(cd)
    wreg_cd = wreg.astype(cd)
    wreg_w2_cd = wreg_w2.astype(cd)

    kernel = functools.partial(_sids_kernel, num_layer=num_layer,
                               compute_dtype=cd)

    pred_pad = pl.pallas_call(
        kernel,
        out_shape=jax.ShapeDtypeStruct((B, 1, N_pad), jnp.float32),
        grid_spec=pltpu.PrefetchScalarGridSpec(
            num_scalar_prefetch=0,
            grid=(n_tiles, B),                # node tiles outer, batch inner
            in_specs=[
                pl.BlockSpec((1, L, tile_n), lambda n, b: (b, 0, n)),     # x
                pl.BlockSpec((D, tile_n), lambda n, b: (0, n)),           # node^T
                pl.BlockSpec((E, L), lambda n, b: (0, 0)),                # wts
                pl.BlockSpec((E, 1), lambda n, b: (0, 0)),                # bts
                pl.BlockSpec((num_layer, H, H), lambda n, b: (0, 0, 0)),  # w1
                pl.BlockSpec((num_layer, H, 1), lambda n, b: (0, 0, 0)),  # b1
                pl.BlockSpec((num_layer, H, H), lambda n, b: (0, 0, 0)),  # w2
                pl.BlockSpec((num_layer, H, 1), lambda n, b: (0, 0, 0)),  # b2
                pl.BlockSpec((1, H), lambda n, b: (0, 0)),                # wreg
                pl.BlockSpec((1, H), lambda n, b: (0, 0)),                # wreg@w2[-1]
                pl.BlockSpec((1, 1), lambda n, b: (0, 0)),                # wreg@b2[-1]+breg
            ],
            out_specs=pl.BlockSpec((1, 1, tile_n), lambda n, b: (b, 0, n)),
            scratch_shapes=[pltpu.VMEM((H, tile_n), jnp.float32)],
        ),
        compiler_params=pltpu.CompilerParams(
            dimension_semantics=("parallel", "parallel")),
    )(x_cd, node_t, wts_cd, bts, w1_cd, b1, w2_cd, b2,
      wreg_cd, wreg_w2_cd, creg)

    pred = pred_pad[:, 0, :N]                            # drop padded lanes

    if return_matrix:
        # torch: node_emb expanded over batch, transposed -> [B, D, N] (glue)
        node_emb_out = jnp.broadcast_to(node_emb.T[None], (B, D, N))
        return pred, node_emb_out
    return pred


def _reference(history_data, params, num_layer):
    """Pure-JAX reference matching the PyTorch forward (eval mode)."""
    x = history_data[..., 0]                                  # [B, L, N]
    ts = jnp.einsum("el,bln->ben", params["wts"], x) + params["bts"][None]
    node_t = params["node_emb"].T                             # [D, N]
    B = x.shape[0]
    h = jnp.concatenate(
        [ts, jnp.broadcast_to(node_t[None], (B,) + node_t.shape)], axis=1)
    for l in range(num_layer):
        z = jnp.einsum("oh,bhn->bon", params["w1"][l], h) + params["b1"][l][None]
        z = jnp.maximum(z, 0.0)
        h = jnp.einsum("oh,bhn->bon", params["w2"][l], z) + params["b2"][l][None] + h
    pred = jnp.einsum("oh,bhn->bon", params["wreg"], h) + params["breg"][None]
    return pred[:, 0, :]                                      # [B, N]


def _make_params(key, N, L, E, D, num_layer):
    H = E + D
    ks = jax.random.split(key, 10)

    def xavier(k, shape):
        fan_in, fan_out = shape[-1], shape[-2]
        limit = (6.0 / (fan_in + fan_out)) ** 0.5
        return jax.random.uniform(k, shape, jnp.float32, -limit, limit)

    return {
        "node_emb": xavier(ks[0], (N, D)),
        "wts": xavier(ks[1], (E, L)),
        "bts": jax.random.normal(ks[2], (E, 1), jnp.float32) * 0.01,
        "w1": xavier(ks[3], (num_layer, H, H)),
        "b1": jax.random.normal(ks[4], (num_layer, H, 1), jnp.float32) * 0.01,
        "w2": xavier(ks[5], (num_layer, H, H)),
        "b2": jax.random.normal(ks[6], (num_layer, H, 1), jnp.float32) * 0.01,
        "wreg": xavier(ks[7], (1, H)),
        "breg": jax.random.normal(ks[8], (1, 1), jnp.float32) * 0.01,
    }


if __name__ == "__main__":
    # Small shapes consistent with the module:
    #   B=2 batches, L=8 history steps (input_len), N=16 nodes, C=1 feature
    #   embed_dim=32, node_dim=32  ->  hidden_dim H=64, num_layer=2
    B, L, N, C = 2, 8, 16, 1
    E, D, NUM_LAYER = 32, 32, 2

    key = jax.random.PRNGKey(0)
    k_hist, k_params, k_hist2, k_params2 = jax.random.split(key, 4)

    history = jax.random.normal(k_hist, (B, L, N, C), dtype=jnp.float32)
    params = _make_params(k_params, N, L, E, D, NUM_LAYER)

    pred, node_emb_out = sids_forward(
        history, params, num_layer=NUM_LAYER, return_matrix=True)
    jax.block_until_ready((pred, node_emb_out))

    assert pred.shape == (B, N)
    assert node_emb_out.shape == (B, D, N)

    ref = _reference(history, params, NUM_LAYER)
    assert jnp.allclose(pred, ref, atol=1e-4, rtol=1e-4), (
        float(jnp.max(jnp.abs(pred - ref))))

    # Second check with N > 128: exercises the multi-node-tile grid and the
    # lane padding / slicing path (f32, exact semantics).
    B2, N2 = 2, 200
    history2 = jax.random.normal(k_hist2, (B2, L, N2, C), dtype=jnp.float32)
    params2 = _make_params(k_params2, N2, L, E, D, NUM_LAYER)
    pred2 = sids_forward(history2, params2, num_layer=NUM_LAYER,
                         return_matrix=False)
    jax.block_until_ready(pred2)
    ref2 = _reference(history2, params2, NUM_LAYER)
    assert pred2.shape == (B2, N2)
    assert jnp.allclose(pred2, ref2, atol=1e-4, rtol=1e-4), (
        float(jnp.max(jnp.abs(pred2 - ref2))))

    # Third check: bf16 MXU-operand path (perf option for v5e/v6e/v7x);
    # accumulation / bias / residual stay f32, so error stays small.
    pred_bf16 = sids_forward(history2, params2, num_layer=NUM_LAYER,
                             return_matrix=False, compute_dtype=jnp.bfloat16)
    jax.block_until_ready(pred_bf16)
    assert jnp.allclose(pred_bf16, ref2, atol=1.5e-1, rtol=1e-1), (
        float(jnp.max(jnp.abs(pred_bf16 - ref2))))

    print("KERNEL_OK")
</pallas_src>

<mosaic_0001>
module attributes {stable_mosaic.version = 11 : i64} {
  func.func @_sids_kernel(%arg0: i32, %arg1: i32, %arg2: memref<1x8x128xf32, #tpu.memory_space<vmem>>, %arg3: memref<32x128xf32, #tpu.memory_space<vmem>>, %arg4: memref<32x8xf32, #tpu.memory_space<vmem>>, %arg5: memref<32x1xf32, #tpu.memory_space<vmem>>, %arg6: memref<2x64x64xf32, #tpu.memory_space<vmem>>, %arg7: memref<2x64x1xf32, #tpu.memory_space<vmem>>, %arg8: memref<2x64x64xf32, #tpu.memory_space<vmem>>, %arg9: memref<2x64x1xf32, #tpu.memory_space<vmem>>, %arg10: memref<1x64xf32, #tpu.memory_space<vmem>>, %arg11: memref<1x64xf32, #tpu.memory_space<vmem>>, %arg12: memref<1x1xf32, #tpu.memory_space<vmem>>, %arg13: memref<1x1x128xf32, #tpu.memory_space<vmem>>, %arg14: memref<64x128xf32, #tpu.memory_space<vmem>>) attributes {dimension_semantics = [#tpu.dimension_semantics<parallel>, #tpu.dimension_semantics<parallel>], iteration_bounds = array<i64: 1, 2>, scalar_prefetch = 0 : i64, scratch_operands = 1 : i64, tpu.core_type = #tpu.core_type<tc>, window_params = [{transform_indices = @transform_0, window_bounds = array<i64: 1, 8, 128>}, {transform_indices = @transform_1, window_bounds = array<i64: 32, 128>}, {pipeline_mode = #tpu.pipeline_mode<synchronous>, transform_indices = @transform_2, window_bounds = array<i64: 32, 8>}, {pipeline_mode = #tpu.pipeline_mode<synchronous>, transform_indices = @transform_3, window_bounds = array<i64: 32, 1>}, {pipeline_mode = #tpu.pipeline_mode<synchronous>, transform_indices = @transform_4, window_bounds = array<i64: 2, 64, 64>}, {pipeline_mode = #tpu.pipeline_mode<synchronous>, transform_indices = @transform_5, window_bounds = array<i64: 2, 64, 1>}, {pipeline_mode = #tpu.pipeline_mode<synchronous>, transform_indices = @transform_6, window_bounds = array<i64: 2, 64, 64>}, {pipeline_mode = #tpu.pipeline_mode<synchronous>, transform_indices = @transform_7, window_bounds = array<i64: 2, 64, 1>}, {pipeline_mode = #tpu.pipeline_mode<synchronous>, transform_indices = @transform_8, window_bounds = array<i64: 1, 64>}, {pipeline_mode = #tpu.pipeline_mode<synchronous>, transform_indices = @transform_9, window_bounds = array<i64: 1, 64>}, {pipeline_mode = #tpu.pipeline_mode<synchronous>, transform_indices = @transform_10, window_bounds = array<i64: 1, 1>}, {transform_indices = @transform_11, window_bounds = array<i64: 1, 1, 128>}]} {
    %c0 = arith.constant 0 : index
    %c0_0 = arith.constant 0 : index
    %c0_1 = arith.constant 0 : index
    %0 = vector.load %arg2[%c0, %c0_0, %c0_1] : memref<1x8x128xf32, #tpu.memory_space<vmem>>, vector<1x8x128xf32>
    %1 = vector.shape_cast %0 : vector<1x8x128xf32> to vector<8x128xf32>
    %c0_2 = arith.constant 0 : index
    %c0_3 = arith.constant 0 : index
    %2 = vector.load %arg3[%c0_2, %c0_3] : memref<32x128xf32, #tpu.memory_space<vmem>>, vector<32x128xf32>
    %c0_4 = arith.constant 0 : index
    %c0_5 = arith.constant 0 : index
    %3 = vector.load %arg4[%c0_4, %c0_5] : memref<32x8xf32, #tpu.memory_space<vmem>>, vector<32x8xf32>
    %cst = arith.constant dense<0.000000e+00> : vector<32x128xf32>
    %4 = tpu.matmul %3, %1, %cst {dimension_numbers = #tpu.dot_dimension_numbers<[1], [0], [0], [1], [0, 0, 1, 1], [], []>} : vector<32x8xf32>, vector<8x128xf32>, vector<32x128xf32> -> vector<32x128xf32>
    %c0_6 = arith.constant 0 : index
    %c0_7 = arith.constant 0 : index
    %5 = vector.load %arg5[%c0_6, %c0_7] : memref<32x1xf32, #tpu.memory_space<vmem>>, vector<32x1xf32>
    %6 = vector.broadcast %5 : vector<32x1xf32> to vector<32x128xf32>
    %7 = arith.addf %4, %6 : vector<32x128xf32>
    %c0_8 = arith.constant 0 : index
    %c0_9 = arith.constant 0 : index
    %8 = vector.load %arg14[%c0_8, %c0_9] : memref<64x128xf32, #tpu.memory_space<vmem>>, vector<32x128xf32>
    tpu.vector_store %arg14[%c0_8, %c0_9], %7 {strides = array<i32>} : memref<64x128xf32, #tpu.memory_space<vmem>>, vector<32x128xf32>,
    %c32 = arith.constant 32 : index
    %c0_10 = arith.constant 0 : index
    %9 = vector.load %arg14[%c32, %c0_10] : memref<64x128xf32, #tpu.memory_space<vmem>>, vector<32x128xf32>
    tpu.vector_store %arg14[%c32, %c0_10], %2 {strides = array<i32>} : memref<64x128xf32, #tpu.memory_space<vmem>>, vector<32x128xf32>,
    %c0_11 = arith.constant 0 : index
    %c0_12 = arith.constant 0 : index
    %10 = vector.load %arg14[%c0_11, %c0_12] : memref<64x128xf32, #tpu.memory_space<vmem>>, vector<64x128xf32>
    %c0_13 = arith.constant 0 : index
    %c0_14 = arith.constant 0 : index
    %c0_15 = arith.constant 0 : index
    %11 = vector.load %arg6[%c0_13, %c0_14, %c0_15] : memref<2x64x64xf32, #tpu.memory_space<vmem>>, vector<1x64x64xf32>
    %12 = vector.shape_cast %11 : vector<1x64x64xf32> to vector<64x64xf32>
    %cst_16 = arith.constant dense<0.000000e+00> : vector<64x128xf32>
    %13 = tpu.matmul %12, %10, %cst_16 {dimension_numbers = #tpu.dot_dimension_numbers<[1], [0], [0], [1], [0, 0, 1, 1], [], []>} : vector<64x64xf32>, vector<64x128xf32>, vector<64x128xf32> -> vector<64x128xf32>
    %c0_17 = arith.constant 0 : index
    %c0_18 = arith.constant 0 : index
    %c0_19 = arith.constant 0 : index
    %14 = vector.load %arg7[%c0_17, %c0_18, %c0_19] : memref<2x64x1xf32, #tpu.memory_space<vmem>>, vector<1x64x1xf32>
    %15 = vector.shape_cast %14 : vector<1x64x1xf32> to vector<64x1xf32>
    %16 = vector.broadcast %15 : vector<64x1xf32> to vector<64x128xf32>
    %17 = arith.addf %13, %16 : vector<64x128xf32>
    %cst_20 = arith.constant 0.000000e+00 : f32
    %18 = vector.broadcast %cst_20 : f32 to vector<64x128xf32>
    %19 = arith.maximumf %17, %18 : vector<64x128xf32>
    %c0_21 = arith.constant 0 : index
    %c0_22 = arith.constant 0 : index
    %c0_23 = arith.constant 0 : index
    %20 = vector.load %arg8[%c0_21, %c0_22, %c0_23] : memref<2x64x64xf32, #tpu.memory_space<vmem>>, vector<1x64x64xf32>
    %21 = vector.shape_cast %20 : vector<1x64x64xf32> to vector<64x64xf32>
    %cst_24 = arith.constant dense<0.000000e+00> : vector<64x128xf32>
    %22 = tpu.matmul %21, %19, %cst_24 {dimension_numbers = #tpu.dot_dimension_numbers<[1], [0], [0], [1], [0, 0, 1, 1], [], []>} : vector<64x64xf32>, vector<64x128xf32>, vector<64x128xf32> -> vector<64x128xf32>
    %c0_25 = arith.constant 0 : index
    %c0_26 = arith.constant 0 : index
    %c0_27 = arith.constant 0 : index
    %23 = vector.load %arg9[%c0_25, %c0_26, %c0_27] : memref<2x64x1xf32, #tpu.memory_space<vmem>>, vector<1x64x1xf32>
    %24 = vector.shape_cast %23 : vector<1x64x1xf32> to vector<64x1xf32>
    %25 = vector.broadcast %24 : vector<64x1xf32> to vector<64x128xf32>
    %26 = arith.addf %22, %25 : vector<64x128xf32>
    %27 = arith.addf %26, %10 : vector<64x128xf32>
    %c0_28 = arith.constant 0 : index
    %c0_29 = arith.constant 0 : index
    %28 = vector.load %arg14[%c0_28, %c0_29] : memref<64x128xf32, #tpu.memory_space<vmem>>, vector<64x128xf32>
    tpu.vector_store %arg14[%c0_28, %c0_29], %27 {strides = array<i32>} : memref<64x128xf32, #tpu.memory_space<vmem>>, vector<64x128xf32>,
    %c0_30 = arith.constant 0 : index
    %c0_31 = arith.constant 0 : index
    %29 = vector.load %arg14[%c0_30, %c0_31] : memref<64x128xf32, #tpu.memory_space<vmem>>, vector<64x128xf32>
    %c1 = arith.constant 1 : index
    %c0_32 = arith.constant 0 : index
    %c0_33 = arith.constant 0 : index
    %30 = vector.load %arg6[%c1, %c0_32, %c0_33] : memref<2x64x64xf32, #tpu.memory_space<vmem>>, vector<1x64x64xf32>
    %31 = vector.shape_cast %30 : vector<1x64x64xf32> to vector<64x64xf32>
    %cst_34 = arith.constant dense<0.000000e+00> : vector<64x128xf32>
    %32 = tpu.matmul %31, %29, %cst_34 {dimension_numbers = #tpu.dot_dimension_numbers<[1], [0], [0], [1], [0, 0, 1, 1], [], []>} : vector<64x64xf32>, vector<64x128xf32>, vector<64x128xf32> -> vector<64x128xf32>
    %c1_35 = arith.constant 1 : index
    %c0_36 = arith.constant 0 : index
    %c0_37 = arith.constant 0 : index
    %33 = vector.load %arg7[%c1_35, %c0_36, %c0_37] : memref<2x64x1xf32, #tpu.memory_space<vmem>>, vector<1x64x1xf32>
    %34 = vector.shape_cast %33 : vector<1x64x1xf32> to vector<64x1xf32>
    %35 = vector.broadcast %34 : vector<64x1xf32> to vector<64x128xf32>
    %36 = arith.addf %32, %35 : vector<64x128xf32>
    %cst_38 = arith.constant 0.000000e+00 : f32
    %37 = vector.broadcast %cst_38 : f32 to vector<64x128xf32>
    %38 = arith.maximumf %36, %37 : vector<64x128xf32>
    %c0_39 = arith.constant 0 : index
    %c0_40 = arith.constant 0 : index
    %39 = vector.load %arg11[%c0_39, %c0_40] : memref<1x64xf32, #tpu.memory_space<vmem>>, vector<1x64xf32>
    %cst_41 = arith.constant dense<0.000000e+00> : vector<1x128xf32>
    %40 = tpu.matmul %39, %38, %cst_41 {dimension_numbers = #tpu.dot_dimension_numbers<[1], [0], [0], [1], [0, 0, 1, 1], [], []>} : vector<1x64xf32>, vector<64x128xf32>, vector<1x128xf32> -> vector<1x128xf32>
    %c0_42 = arith.constant 0 : index
    %c0_43 = arith.constant 0 : index
    %41 = vector.load %arg10[%c0_42, %c0_43] : memref<1x64xf32, #tpu.memory_space<vmem>>, vector<1x64xf32>
    %cst_44 = arith.constant dense<0.000000e+00> : vector<1x128xf32>
    %42 = tpu.matmul %41, %29, %cst_44 {dimension_numbers = #tpu.dot_dimension_numbers<[1], [0], [0], [1], [0, 0, 1, 1], [], []>} : vector<1x64xf32>, vector<64x128xf32>, vector<1x128xf32> -> vector<1x128xf32>
    %43 = arith.addf %40, %42 : vector<1x128xf32>
    %c0_45 = arith.constant 0 : index
    %c0_46 = arith.constant 0 : index
    %44 = vector.load %arg12[%c0_45, %c0_46] : memref<1x1xf32, #tpu.memory_space<vmem>>, vector<1x1xf32>
    %45 = vector.broadcast %44 : vector<1x1xf32> to vector<1x128xf32>
    %46 = arith.addf %43, %45 : vector<1x128xf32>
    %c0_47 = arith.constant 0 : index
    %c0_48 = arith.constant 0 : index
    %c0_49 = arith.constant 0 : index
    %47 = vector.load %arg13[%c0_47, %c0_48, %c0_49] : memref<1x1x128xf32, #tpu.memory_space<vmem>>, vector<1x1x128xf32>
    %48 = vector.shape_cast %47 : vector<1x1x128xf32> to vector<1x128xf32>
    %49 = vector.shape_cast %46 : vector<1x128xf32> to vector<1x1x128xf32>
    tpu.vector_store %arg13[%c0_47, %c0_48, %c0_49], %49 {strides = array<i32>} : memref<1x1x128xf32, #tpu.memory_space<vmem>>, vector<1x1x128xf32>,
    return
  }
  func.func @transform_0(%arg0: i32, %arg1: i32) -> (i32, i32, i32) {
    %c0_i32 = arith.constant 0 : i32
    %c0_i32_0 = arith.constant 0 : i32
    return %arg1, %c0_i32, %arg0 : i32, i32, i32
  }
  func.func @transform_1(%arg0: i32, %arg1: i32) -> (i32, i32) {
    %c0_i32 = arith.constant 0 : i32
    %c0_i32_0 = arith.constant 0 : i32
    return %c0_i32, %arg0 : i32, i32
  }
  func.func @transform_2(%arg0: i32, %arg1: i32) -> (i32, i32) {
    %c0_i32 = arith.constant 0 : i32
    %c0_i32_0 = arith.constant 0 : i32
    %c0_i32_1 = arith.constant 0 : i32
    return %c0_i32, %c0_i32_0 : i32, i32
  }
  func.func @transform_3(%arg0: i32, %arg1: i32) -> (i32, i32) {
    %c0_i32 = arith.constant 0 : i32
    %c0_i32_0 = arith.constant 0 : i32
    %c0_i32_1 = arith.constant 0 : i32
    return %c0_i32, %c0_i32_0 : i32, i32
  }
  func.func @transform_4(%arg0: i32, %arg1: i32) -> (i32, i32, i32) {
    %c0_i32 = arith.constant 0 : i32
    %c0_i32_0 = arith.constant 0 : i32
    %c0_i32_1 = arith.constant 0 : i32
    %c0_i32_2 = arith.constant 0 : i32
    return %c0_i32, %c0_i32_0, %c0_i32_1 : i32, i32, i32
  }
  func.func @transform_5(%arg0: i32, %arg1: i32) -> (i32, i32, i32) {
    %c0_i32 = arith.constant 0 : i32
    %c0_i32_0 = arith.constant 0 : i32
    %c0_i32_1 = arith.constant 0 : i32
    %c0_i32_2 = arith.constant 0 : i32
    return %c0_i32, %c0_i32_0, %c0_i32_1 : i32, i32, i32
  }
  func.func @transform_6(%arg0: i32, %arg1: i32) -> (i32, i32, i32) {
    %c0_i32 = arith.constant 0 : i32
    %c0_i32_0 = arith.constant 0 : i32
    %c0_i32_1 = arith.constant 0 : i32
    %c0_i32_2 = arith.constant 0 : i32
    return %c0_i32, %c0_i32_0, %c0_i32_1 : i32, i32, i32
  }
  func.func @transform_7(%arg0: i32, %arg1: i32) -> (i32, i32, i32) {
    %c0_i32 = arith.constant 0 : i32
    %c0_i32_0 = arith.constant 0 : i32
    %c0_i32_1 = arith.constant 0 : i32
    %c0_i32_2 = arith.constant 0 : i32
    return %c0_i32, %c0_i32_0, %c0_i32_1 : i32, i32, i32
  }
  func.func @transform_8(%arg0: i32, %arg1: i32) -> (i32, i32) {
    %c0_i32 = arith.constant 0 : i32
    %c0_i32_0 = arith.constant 0 : i32
    %c0_i32_1 = arith.constant 0 : i32
    return %c0_i32, %c0_i32_0 : i32, i32
  }
  func.func @transform_9(%arg0: i32, %arg1: i32) -> (i32, i32) {
    %c0_i32 = arith.constant 0 : i32
    %c0_i32_0 = arith.constant 0 : i32
    %c0_i32_1 = arith.constant 0 : i32
    return %c0_i32, %c0_i32_0 : i32, i32
  }
  func.func @transform_10(%arg0: i32, %arg1: i32) -> (i32, i32) {
    %c0_i32 = arith.constant 0 : i32
    %c0_i32_0 = arith.constant 0 : i32
    %c0_i32_1 = arith.constant 0 : i32
    return %c0_i32, %c0_i32_0 : i32, i32
  }
  func.func @transform_11(%arg0: i32, %arg1: i32) -> (i32, i32, i32) {
    %c0_i32 = arith.constant 0 : i32
    %c0_i32_0 = arith.constant 0 : i32
    return %arg1, %c0_i32, %arg0 : i32, i32, i32
  }
}

</mosaic_0001>

<bundles_post_ra>
// kernel: tpu_custom_call.1
= control target key start
LH: loop header
LB: loop body
LE: loop exit
PB: predicated region body
PF: predicated region fallthrough
CT: control target
= control target key end

     0   :  { %s2332_s0 = inlined_call_operand.vmem [shape: f32[2,8,128], index: 0, kind: input, shape index: {}]   ;;  %s2333_s1 = inlined_call_operand.vmem [shape: f32[32,128], index: 1, kind: input, shape index: {}]   ;;  %s2334_s2 = inlined_call_operand.vmem [shape: f32[32,8], index: 2, kind: input, shape index: {}]   ;;  %s2335_s3 = inlined_call_operand.vmem [shape: f32[32,1], index: 3, kind: input, shape index: {}]   ;;  %s2336_s4 = inlined_call_operand.vmem [shape: f32[2,64,64], index: 4, kind: input, shape index: {}]   ;;  %s2337_s5 = inlined_call_operand.vmem [shape: f32[2,64,1], index: 5, kind: input, shape index: {}]   ;;  %s2338_s6 = inlined_call_operand.vmem [shape: f32[2,64,64], index: 6, kind: input, shape index: {}]   ;;  %s2339_s7 = inlined_call_operand.vmem [shape: f32[2,64,1], index: 7, kind: input, shape index: {}]   ;;  %s2340_s8 = inlined_call_operand.vmem [shape: f32[1,64], index: 8, kind: input, shape index: {}]   ;;  %s2341_s9 = inlined_call_operand.vmem [shape: f32[1,64], index: 9, kind: input, shape index: {}]   ;;  %s2342_s10 = inlined_call_operand.<no memory space> [shape: f32[1,1], index: 10, kind: input, shape index: {}]   ;;  %s2343_s11 = inlined_call_operand.hbm [shape: f32[2,1,128], index: 11, kind: output, shape index: {}]  }
   0x1   :  { %v16_v0 = vstv %s2342_s10 }
   0x2   :  { %17 = vst [vmem:[#allocation3] sm:$0x1] %v16_v0 }
   0x3   :  { %18 = vsyncpa [#allocation5], 0 }
   0x4   :  { %20 = vsyncpa [#allocation5 + $0x1], 0  ;;  %s1964_s19 = smov 0   ;;  %s1966_s20 = smov 0  }
   0x5   :  { %s1968_s21 = smov 0   ;;  %s1970_s22 = smov 0  }
   0x6   :  { %s1972_s23 = smov 0   ;;  %s1974_s24 = smov 0  }
   0x7 LB: > { %2346 = sst [smem:[#allocation7_spill]] %s1890_s23  ;;  %s1426_s10 = sadd.s32 4294967295, %s1894_s24   ;;  %s1894_s24 = sphi %s1974_s24, %s26_s24   ;;  %s1890_s23 = sphi %s1972_s23, %s2353_s23   ;;  %s1886_s22 = sphi %s1970_s22, %s2352_s22   ;;  %s1882_s21 = sphi %s1968_s21, %s2356_s21   ;;  %s1878_s20 = sphi %s1966_s20, %s2355_s20   ;;  %s1874_s19 = sphi %s1964_s19, %s2354_s19  }
   0x8   : > { %s1427_s25 = sadd.s32 4294967294, %s1894_s24   ;;  %s35_s26 = sadd.s32 1, %s1890_s23 }
   0x9   : > { %s290_s27 = sadd.s32 1, %s1882_s21  ;;  %p36_p0 = scmp.ge.s32.totalorder %s35_s26, 2 }
   0xa   : > { %p300_p1 = scmp.ne.s32.totalorder %s1882_s21, %s1878_s20  ;;  %p301_p2 = scmp.eq.s32.totalorder %s1426_s10, 1 }
   0xb   : > { %p306_p3 = scmp.ne.s32.totalorder %s1878_s20, %s1874_s19  ;;  %s2358_s26 = smov (%p36_p0, %s35_s26), 0 }
   0xc   : > { %2347 = sst [smem:[#allocation8_spill]] %s2358_s26  ;;  %p2004_p4 = por %p301_p2, %p300_p1 }
   0xd   : > { %p307_p5 = scmp.eq.s32.totalorder %s1427_s25, 1  ;;  %s285_s29 = ssub.s32 %s1890_s23, %s2358_s26 }
   0xe   : > { %p1431_p6 = scmp.ge.s32.totalorder %s1894_s24, 1  ;;  %p288_p7 = scmp.eq.s32.totalorder %s285_s29, 0 }
   0xf   : > { %p2011_p8 = por %p307_p5, %p306_p3  ;;  %p369_p9 = scmp.lt.s32.totalorder %s1894_s24, 3 }
  0x10   : > { %s2017_s12 = scalar_select %p288_p7, %s1882_s21, %s290_s27  }
  0x11   : > { %p370_p10 = pnand %p1431_p6, %p369_p9 }
  0x12   : > { %2350 = sst [smem:[#allocation9_spill]] %s2017_s12  ;;  %p414_p11 = scmp.lt.s32.totalorder (!%p370_p10), %s1886_s22, 1  ;;  %v430_v1 = vld [vmem:[%s2334_s2] sm:$0xff] (!%p370_p10)  ;;  %vm458_vm0 = vcmask (!%p370_p10), 64512   ;;  %v1896_v2 = vmov (!%p370_p10), 0   ;;  %v436_v4 = vld [vmem:[%s2335_s3 + $0x10] sm:$0xff] (!%p370_p10) }
  0x13   : > { %373 = sbr.rel (%p370_p10) target bundleno = 1200 (0x4b0), region = 64  ;;  %1555 = vmatprep.mubr.msk.f32.mxu0 (!%p370_p10), %vm458_vm0, %v430_v1  ;;  %1814 = vset.pattern.permute.xlu0 (!%p370_p10), %v1896_v2  ;;  %v434_v3 = vld [vmem:[%s2335_s3] sm:$0xff] (!%p370_p10)  ;;  %v435_v5 = vld [vmem:[%s2335_s3 + $0x8] sm:$0xff] (!%p370_p10)  ;;  %v437_v6 = vld [vmem:[%s2335_s3 + $0x18] sm:$0xff] (!%p370_p10)  ;;  %vm628_vm1 = vcmask (!%p370_p10), 523264   ;;  %vm1898_vm2 = vmmov (!%p370_p10), 0  }
  0x14   : > { %440 = vperm.xlu0 (!%p370_p10), %1814, %v434_v3   ;;  %1815 = vset.pattern.permute.xlu1 (!%p370_p10), %v1896_v2  ;;  %v431_v8 = vld [vmem:[%s2334_s2 + $0x8] sm:$0xff] (!%p370_p10)  ;;  %v432_v9 = vld [vmem:[%s2334_s2 + $0x10] sm:$0xff] (!%p370_p10)  ;;  %v580_v10 = vld [vmem:[%s2337_s5] sm:$0xff] (!%p370_p10)  ;;  %s1479_s13 = sshll.u32 (!%p370_p10), %s1886_s22, 4 }
  0x15   : > { %450 = vperm.xlu1 (!%p370_p10), %1815, %v436_v4   ;;  %v581_v11 = vld [vmem:[%s2337_s5 + $0x8] sm:$0xff] (!%p370_p10)  ;;  %v433_v12 = vld [vmem:[%s2334_s2 + $0x18] sm:$0xff] (!%p370_p10)  ;;  %v582_v13 = vld [vmem:[%s2337_s5 + $0x10] sm:$0xff] (!%p370_p10)  ;;  %s2285_s10 = scalar_lea.hbm (!%p370_p10), %s2343_s11, %s1479_s13 }
  0x16   : > { %v583_v14 = vld [vmem:[%s2337_s5 + $0x18] sm:$0xff] (!%p370_p10)  ;;  %v584_v15 = vld [vmem:[%s2337_s5 + $0x20] sm:$0xff] (!%p370_p10)  ;;  %v585_v16 = vld [vmem:[%s2337_s5 + $0x28] sm:$0xff] (!%p370_p10) }
  0x17   : > { %v586_v17 = vld [vmem:[%s2337_s5 + $0x30] sm:$0xff] (!%p370_p10)  ;;  %v587_v18 = vld [vmem:[%s2337_s5 + $0x38] sm:$0xff] (!%p370_p10)  ;;  %v774_v19 = vld [vmem:[%s2339_s7] sm:$0xff] (!%p370_p10) }
  0x18   : > { %445 = vperm.xlu0 (!%p370_p10), %1814, %v435_v5   ;;  %v775_v20 = vld [vmem:[%s2339_s7 + $0x8] sm:$0xff] (!%p370_p10)  ;;  %v776_v21 = vld [vmem:[%s2339_s7 + $0x10] sm:$0xff] (!%p370_p10)  ;;  %v777_v22 = vld [vmem:[%s2339_s7 + $0x18] sm:$0xff] (!%p370_p10) }
  0x19   : > { %455 = vperm.xlu1 (!%p370_p10), %1815, %v437_v6   ;;  %v778_v23 = vld [vmem:[%s2339_s7 + $0x20] sm:$0xff] (!%p370_p10)  ;;  %v779_v24 = vld [vmem:[%s2339_s7 + $0x28] sm:$0xff] (!%p370_p10)  ;;  %v780_v25 = vld [vmem:[%s2339_s7 + $0x30] sm:$0xff] (!%p370_p10) }
  0x1a   : > { %s415_s17 = scalar_select %p414_p11, %s1886_s22, 1  ;;  %v781_v26 = vld [vmem:[%s2339_s7 + $0x38] sm:$0xff]  ;;  %v1461_v27 = vld [vmem:[%s2337_s5 + $0x40] sm:$0xff]  ;;  %v1462_v28 = vld [vmem:[%s2337_s5 + $0x48] sm:$0xff] }
  0x1b   : > { %v1463_v29 = vld [vmem:[%s2337_s5 + $0x50] sm:$0xff]  ;;  %v1464_v30 = vld [vmem:[%s2337_s5 + $0x58] sm:$0xff]  ;;  %v1465_v31 = vld [vmem:[%s2337_s5 + $0x60] sm:$0xff]  ;;  %s1900_s22 = smov [#allocation4]  }
  0x1c   : > { %s1432_s29 = sshll.u32 %s415_s17, 3  ;;  %590 = vperm.xlu0 %1814, %v580_v10   ;;  %v1466_v32 = vld [vmem:[%s2337_s5 + $0x68] sm:$0xff]  ;;  %v1467_v33 = vld [vmem:[%s2337_s5 + $0x70] sm:$0xff]  ;;  %v1468_v34 = vld [vmem:[%s2337_s5 + $0x78] sm:$0xff]  ;;  %s1820_s27 = sshll.u32 %s1900_s22, 4  ;;  %s1821_s27 = int_to_ptr.vmem [resolvable:$false] %s1820_s27 }
  0x1d   : > { %s420_s16 = scalar_lea.vmem %s2332_s0, %s1432_s29  ;;  %595 = vperm.xlu1 %1815, %v581_v11   ;;  %v1318_v35 = vld [vmem:[#allocation3] sm:$0x1]  ;;  %v2144_v50 = vld [vmem:[%s2333_s1 + $0x8] sm:$0xff]  ;;  %v2155_v54 = vld [vmem:[%s2333_s1 + $0x10] sm:$0xff]  ;;  %s412_s29 = sand.u32 1, %s1878_s20  }
  0x1e   : > { %v425_v7 = vld [vmem:[%s420_s16] sm:$0xff]  ;;  %v2160_v55 = vld [vmem:[%s2333_s1 + $0x18] sm:$0xff]  ;;  %v573_v57 = vld [vmem:[%s2336_s4 + $0x8] sm:$0xff]  ;;  %s413_s14 = scalar_lea.vmem [#allocation4], %s412_s29  ;;  %s1331_s17 = scalar_lea.sflag [#allocation5], %s412_s29 }
  0x1f   : > { %1553 = vmatprep.subr.mxu0 %v425_v7  ;;  %v572_v36 = vld [vmem:[%s2336_s4] sm:$0xff]  ;;  %v1695_v56 = vpack.c.bf16 %v2160_v55, %v2155_v54  ;;  %v574_v58 = vld [vmem:[%s2336_s4 + $0x10] sm:$0xff]  ;;  %v575_v59 = vld [vmem:[%s2336_s4 + $0x18] sm:$0xff]  ;;  %s1344_s15 = sshll.u32 %s413_s14, 4  ;;  %s1822_s26 = scalar_lea.vmem %s1821_s27, 32  ;;  %s2287_s15 = int_to_ptr.vmem [resolvable:$true] %s1344_s15 }
  0x20   : > { %1554 = vmatpush3.msra.mxu0 %v425_v7  ;;  %600 = vperm.xlu0 %1814, %v582_v13   ;;  %v2139_v49 = vld [vmem:[%s2333_s1] sm:$0xff]  ;;  %v577_v61 = vld [vmem:[%s2336_s4 + $0x28] sm:$0xff]  ;;  %v578_v62 = vld [vmem:[%s2336_s4 + $0x30] sm:$0xff]  ;;  %s1816_s25 = scalar_lea.vmem %s2287_s15, 16  ;;  %p1823_p1 = scmp.lt.s32.totalorder %s2287_s15, %s1821_s27 }
  0x21   : > { %1556 = vmatmul.mubr.msk.f32.vlgmr.msra.gmra.mrb[0].mxu0 %vm458_vm0, %v431_v8  ;;  %605 = vperm.xlu1 %1815, %v583_v14   ;;  %v1691_v53 = vpack.c.bf16 %v2144_v50, %v2139_v49  ;;  %v576_v60 = vld [vmem:[%s2336_s4 + $0x20] sm:$0xff]  ;;  %v579_v63 = vld [vmem:[%s2336_s4 + $0x38] sm:$0xff]  ;;  %p1817_p12 = scmp.ne.s32.totalorder %s2287_s15, %s1816_s25  ;;  %p1824_p2 = scmp.lt.s32.totalorder %s1822_s26, %s1816_s25 }
  0x22   : > { %1558 = vmatprep.mubr.msk.f32.mxu0 %vm458_vm0, %v432_v9  ;;  %1577 = vmatprep.mubr.msk.f32.mxu1 %vm628_vm1, %v572_v36  ;;  %v766_v0 = vld [vmem:[%s2338_s6] sm:$0xff] }
  0x23   : > { %p1818_p13 = pnand %p1817_p12, %p2004_p4  ;;  %p1825_p3 = por %p1824_p2, %p1823_p1 }
  0x24   : > { %610 = vperm.xlu0 %1814, %v584_v15  }
  0x25   : > { %1559 = vmatmul.mubr.msk.f32.gmra.mrb[2].mxu0 %vm458_vm0, %v433_v12  ;;  %615 = vperm.xlu1 %1815, %v585_v16   ;;  %p1819_p0 = pneg %p1818_p13 }
  0x26   : > { %1605 = vmatprep.mubr.msk.f32.mxu0 %vm628_vm1, %v766_v0 }
  0x27   : > { %p1826_p5 = pnand %p1825_p3, %p1819_p0 }
  0x28   : > { %620 = vperm.xlu0 %1814, %v586_v17  }
  0x29   : > { %625 = vperm.xlu1 %1815, %v587_v18  }
  0x2c   : > { %784 = vperm.xlu0 %1814, %v774_v19  }
  0x2d   : > { %789 = vperm.xlu1 %1815, %v775_v20  }
  0x30   : > { %794 = vperm.xlu0 %1814, %v776_v21  }
  0x31   : > { %799 = vperm.xlu1 %1815, %v777_v22  }
  0x34   : > { %804 = vperm.xlu0 %1814, %v778_v23  }
  0x35   : > { %809 = vperm.xlu1 %1815, %v779_v24  }
  0x38   : > { %814 = vperm.xlu0 %1814, %v780_v25  }
  0x39   : > { %819 = vperm.xlu1 %1815, %v781_v26  }
  0x3c   : > { %995 = vperm.xlu0 %1814, %v1461_v27  }
  0x3d   : > { %1000 = vperm.xlu1 %1815, %v1462_v28  }
  0x40   : > { %1005 = vperm.xlu0 %1814, %v1463_v29  }
  0x41   : > { %1010 = vperm.xlu1 %1815, %v1464_v30  }
  0x44   : > { %1015 = vperm.xlu0 %1814, %v1465_v31  }
  0x45   : > { %1020 = vperm.xlu1 %1815, %v1466_v32  }
  0x48   : > { %1025 = vperm.xlu0 %1814, %v1467_v33  }
  0x49   : > { %1030 = vperm.xlu1 %1815, %v1468_v34  }
  0x4c   : > { %1321 = vperm.xlu0 %1814, %v1318_v35  }
  0x93   : > { %v441_v37 = vpop.permute.xlu0 %440 }
  0x94   : > { %v451_v38 = vpop.permute.xlu1 %450 }
  0x97   : > { %v446_v39 = vpop.permute.xlu0 %445 }
  0x98   : > { %v456_v44 = vpop.permute.xlu1 %455 }
  0x9b   : > { %v591_v2 = vpop.permute.xlu0 %590 }
  0x9c   : > { %v596_v1 = vpop.permute.xlu1 %595 }
  0x9f   : > { %v601_v5 = vpop.permute.xlu0 %600 }
  0xa0   : > { %v606_v3 = vpop.permute.xlu1 %605 }
  0xa3   : > { %v611_v17 = vpop.permute.xlu0 %610 }
  0xa4   : > { %v616_v14 = vpop.permute.xlu1 %615 }
  0xa7   : > { %v621_v29 = vpop.permute.xlu0 %620 }
  0xa8   : > { %v626_v26 = vpop.permute.xlu1 %625 }
  0xf4   : > { %v1557_v40 = vpop.f32.mrb[0].mxu0 }
  0xf5   : > { %v2128_v41 = vadd.f32 %v1557_v40, %v446_v39  ;;  %v537_v42 = vpop.f32.mrb[1].mxu0  ;;  %v769_v39 = vld [vmem:[%s2338_s6 + $0x18] sm:$0xff]  ;;  %v770_v40 = vld [vmem:[%s2338_s6 + $0x20] sm:$0xff] }
  0xf6   : > { %v2130_v43 = vadd.f32 %v537_v42, %v441_v37  ;;  %v767_v37 = vld [vmem:[%s2338_s6 + $0x8] sm:$0xff] }
  0xf7   : > { %v771_v42 = vld [vmem:[%s2338_s6 + $0x28] sm:$0xff] }
  0xf8   : > { %v1560_v45 = vpop.f32.mrb[2].mxu0  ;;  %v1683_v46 = vpack.c.bf16 %v2128_v41, %v2130_v43 }
  0xf9   : > { %v2134_v47 = vadd.f32 %v1560_v45, %v456_v44  ;;  %v547_v48 = vpop.f32.mrb[3].mxu0  ;;  %v772_v44 = vld [vmem:[%s2338_s6 + $0x30] sm:$0xff]  ;;  %v773_v45 = vld [vmem:[%s2338_s6 + $0x38] sm:$0xff] }
  0xfa   : > { %v2146_v51 = vadd.f32 %v547_v48, %v451_v38  ;;  %1684 = vmatprep.subr.bf16.mxu1 %v1683_v46  ;;  %v768_v38 = vld [vmem:[%s2338_s6 + $0x10] sm:$0xff]  ;;  %v1453_v48 = vld [vmem:[%s2336_s4 + $0x40] sm:$0xff] }
  0xfb   : > { %1686 = vmatpush3.bf16.msra.mxu1 %v1683_v46  ;;  %v1897_v46 = vmov 0.0|0.0  }
  0xfc   : > { %v1687_v52 = vpack.c.bf16 %v2134_v47, %v2146_v51 }
  0xfe   : > { %1688 = vmatprep.subr.bf16.mxu1 %v1687_v52 }
  0xff   : > { %1690 = vmatpush3.bf16.msra.mxu1 %v1687_v52  ;;  %v790_v52 = vpop.permute.xlu1 %789 }
 0x100   : > { %1692 = vmatprep.subr.bf16.mxu1 %v1691_v53 }
 0x103   : > { %1694 = vmatpush3.bf16.msra.mxu1 %v1691_v53  ;;  %v785_v53 = vpop.permute.xlu0 %784 }
 0x104   : > { %1696 = vmatprep.subr.bf16.mxu1 %v1695_v56 }
 0x107   : > { %1698 = vmatpush3.bf16.msra.mxu1 %v1695_v56  ;;  %v800_v56 = vpop.permute.xlu1 %799 }
 0x10a   : > { %1578 = vmatmul.mubr.msk.f32.vlgmr.msra.gmra.mrb[0].mxu1 %vm628_vm1, %v573_v57 }
 0x10b   : > { %1580 = vmatprep.mubr.msk.f32.mxu1 %vm628_vm1, %v574_v58  ;;  %v795_v58 = vpop.permute.xlu0 %794 }
 0x10e   : > { %1581 = vmatmul.mubr.msk.f32.gmra.mrb[2].mxu1 %vm628_vm1, %v575_v59 }
 0x10f   : > { %1583 = vmatprep.mubr.msk.f32.mxu1 %vm628_vm1, %v576_v60 }
 0x112   : > { %1584 = vmatmul.mubr.msk.f32.gmra.mrb[4].mxu1 %vm628_vm1, %v577_v61 }
 0x113   : > { %1586 = vmatprep.mubr.msk.f32.mxu1 %vm628_vm1, %v578_v62 }
 0x116   : > { %1587 = vmatmul.mubr.msk.f32.gmra.mrb[6].mxu1 %vm628_vm1, %v579_v63 }
 0x117   : > { %1633 = vmatprep.mubr.msk.f32.mxu1 %vm628_vm1, %v1453_v48 }
 0x1dd   : > { %v1579_v4 = vpop.f32.mrb[0].mxu1 }
 0x1de   : > { %v725_v6 = vadd.f32 %v1579_v4, %v596_v1  ;;  %v719_v7 = vpop.f32.mrb[1].mxu1 }
 0x1df   : > { %v720_v8 = vadd.f32 %v719_v7, %v591_v2 }
 0x1e0   : > { %v759_v9 = vmax.f32 %v725_v6, 0.0  ;;  %v805_v6 = vpop.permute.xlu0 %804 }
 0x1e1   : > { %v758_v10 = vmax.f32 %v720_v8, 0.0  ;;  %v1582_v11 = vpop.f32.mrb[2].mxu1 }
 0x1e2   : > { %v735_v12 = vadd.f32 %v1582_v11, %v606_v3  ;;  %v729_v13 = vpop.f32.mrb[3].mxu1  ;;  %v810_v3 = vpop.permute.xlu1 %809 }
 0x1e3   : > { %v1699_v15 = vpack.c.bf16 %v759_v9, %v758_v10  ;;  %v730_v16 = vadd.f32 %v729_v13, %v601_v5 }
 0x1e4   : > { %v761_v18 = vmax.f32 %v735_v12, 0.0 }
 0x1e5   : > { %v760_v19 = vmax.f32 %v730_v16, 0.0  ;;  %v1585_v20 = vpop.f32.mrb[4].mxu1  ;;  %1700 = vmatprep.subr.bf16.mxu0 %v1699_v15 }
 0x1e6   : > { %v745_v21 = vadd.f32 %v1585_v20, %v616_v14  ;;  %v739_v22 = vpop.f32.mrb[5].mxu1  ;;  %1702 = vmatpush3.bf16.msra.mxu0 %v1699_v15  ;;  %v820_v13 = vpop.permute.xlu1 %819 }
 0x1e7   : > { %v1703_v23 = vpack.c.bf16 %v761_v18, %v760_v19  ;;  %v740_v24 = vadd.f32 %v739_v22, %v611_v17  ;;  %v1458_v22 = vld [vmem:[%s2336_s4 + $0x68] sm:$0xff] }
 0x1e8   : > { %v763_v25 = vmax.f32 %v745_v21, 0.0  ;;  %v1455_v21 = vld [vmem:[%s2336_s4 + $0x50] sm:$0xff] }
 0x1e9   : > { %v762_v27 = vmax.f32 %v740_v24, 0.0  ;;  %v1588_v28 = vpop.f32.mrb[6].mxu1  ;;  %1704 = vmatprep.subr.bf16.mxu0 %v1703_v23  ;;  %v1460_v24 = vld [vmem:[%s2336_s4 + $0x78] sm:$0xff] }
 0x1ea   : > { %v755_v30 = vadd.f32 %v1588_v28, %v626_v26  ;;  %v749_v31 = vpop.f32.mrb[7].mxu1  ;;  %1706 = vmatpush3.bf16.msra.mxu0 %v1703_v23  ;;  %v1459_v23 = vld [vmem:[%s2336_s4 + $0x70] sm:$0xff]  ;;  %v1899_v26 = vmov 0.0  }
 0x1eb   : > { %v1707_v32 = vpack.c.bf16 %v763_v25, %v762_v27  ;;  %v750_v33 = vadd.f32 %v749_v31, %v621_v29  ;;  %v1171_v25 = vld [vmem:[%s2340_s8] sm:$0x1]  ;;  %v1001_v27 = vpop.permute.xlu1 %1000 }
 0x1ec   : > { %v765_v34 = vmax.f32 %v755_v30, 0.0 }
 0x1ed   : > { %v764_v35 = vmax.f32 %v750_v33, 0.0  ;;  %1708 = vmatprep.subr.bf16.mxu0 %v1707_v32 }
 0x1ee   : > { %1710 = vmatpush3.bf16.msra.mxu0 %v1707_v32 }
 0x1ef   : > { %v1711_v36 = vpack.c.bf16 %v765_v34, %v764_v35  ;;  %v1011_v29 = vpop.permute.xlu1 %1010 }
 0x1f1   : > { %1712 = vmatprep.subr.bf16.mxu0 %v1711_v36 }
 0x1f2   : > { %1714 = vmatpush3.bf16.msra.mxu0 %v1711_v36 }
 0x1f3   : > { %1731 = vmatprep.subr.bf16.mxu0 %v1897_v46 }
 0x1f5   : > { %1606 = vmatmul.mubr.msk.f32.vlgmr.msra.gmra.mrb[4].mxu0 %vm628_vm1, %v767_v37 }
 0x1f6   : > { %1608 = vmatprep.mubr.msk.f32.mxu0 %vm628_vm1, %v768_v38 }
 0x1f9   : > { %1609 = vmatmul.mubr.msk.f32.gmra.mrb[6].mxu0 %vm628_vm1, %v769_v39 }
 0x1fa   : > { %1611 = vmatprep.mubr.msk.f32.mxu0 %vm628_vm1, %v770_v40  ;;  %v1021_v40 = vpop.permute.xlu1 %1020 }
 0x1fd   : > { %1612 = vmatmul.mubr.msk.f32.gmra.mrb[8].mxu0 %vm628_vm1, %v771_v42 }
 0x1fe   : > { %1614 = vmatprep.mubr.msk.f32.mxu0 %vm628_vm1, %v772_v44 }
 0x201   : > { %1615 = vmatmul.mubr.msk.f32.gmra.mrb[10].mxu0 %vm628_vm1, %v773_v45 }
 0x202   : > { %1661 = vmatprep.mubr.msk.f32.mxu0 %vm1898_vm2, %v1899_v26 }
 0x2c8   : > { %v1607_v57 = vpop.f32.mrb[4].mxu0 }
 0x2c9   : > { %v918_v59 = vadd.f32 %v1607_v57, %v790_v52  ;;  %v912_v60 = vpop.f32.mrb[5].mxu0 }
 0x2ca   : > { %v913_v61 = vadd.f32 %v912_v60, %v785_v53 }
 0x2cb   : > { %v952_v62 = vadd.f32 %v918_v59, %v2128_v41 }
 0x2cc   : > { %v951_v63 = vadd.f32 %v913_v61, %v2130_v43  ;;  %v1610_v0 = vpop.f32.mrb[6].mxu0  ;;  %v1031_v61 = vpop.permute.xlu1 %1030 }
 0x2cd   : > { %v928_v1 = vadd.f32 %v1610_v0, %v800_v56  ;;  %v922_v2 = vpop.f32.mrb[7].mxu0 }
 0x2ce   : > { %v923_v4 = vadd.f32 %v922_v2, %v795_v58  ;;  %v1715_v5 = vpack.c.bf16 %v952_v62, %v951_v63 }
 0x2cf   : > { %v954_v7 = vadd.f32 %v928_v1, %v2134_v47  ;;  %v815_v47 = vpop.permute.xlu0 %814 }
 0x2d0   : > { %v953_v8 = vadd.f32 %v923_v4, %v2146_v51  ;;  %v1613_v9 = vpop.f32.mrb[8].mxu0  ;;  %1716 = vmatprep.subr.bf16.mxu1 %v1715_v5  ;;  %1733 = vmatpush3.bf16.msra.mxu0 %v1715_v5 }
 0x2d1   : > { %v938_v10 = vadd.f32 %v1613_v9, %v810_v3  ;;  %v932_v11 = vpop.f32.mrb[9].mxu0  ;;  %1718 = vmatpush3.bf16.msra.mxu1 %v1715_v5  ;;  %1734 = vmatprep.subr.bf16.mxu0 %v1897_v46 }
 0x2d2   : > { %v933_v41 = vadd.f32 %v932_v11, %v805_v6  ;;  %v1719_v43 = vpack.c.bf16 %v954_v7, %v953_v8  ;;  %v1170_v8 = vld [vmem:[%s2341_s9] sm:$0x1]  ;;  %v1324_v11 = vlaneseq }
 0x2d3   : > { %v956_v12 = vadd.f32 %v938_v10, %v2144_v50  ;;  %v1454_v50 = vld [vmem:[%s2336_s4 + $0x48] sm:$0xff]  ;;  %v996_v28 = vpop.permute.xlu0 %995 }
 0x2d4   : > { %v955_v14 = vadd.f32 %v933_v41, %v2139_v49  ;;  %v1616_v15 = vpop.f32.mrb[10].mxu0  ;;  %1720 = vmatprep.subr.bf16.mxu1 %v1719_v43  ;;  %1736 = vmatpush3.bf16.msra.mxu0 %v1719_v43  ;;  %v1325_v41 = vshrl.u32 %v1324_v11, 7 }
 0x2d5   : > { %v948_v51 = vadd.f32 %v1616_v15, %v820_v13  ;;  %v942_v16 = vpop.f32.mrb[11].mxu0  ;;  %1722 = vmatpush3.bf16.msra.mxu1 %v1719_v43  ;;  %1737 = vmatprep.subr.bf16.mxu0 %v1897_v46 }
 0x2d6   : > { %v943_v17 = vadd.f32 %v942_v16, %v815_v47  ;;  %v1723_v18 = vpack.c.bf16 %v956_v12, %v955_v14  ;;  %v1326_v43 = vsub.s32 0, %v1325_v41 }
 0x2d7   : > { %v958_v19 = vadd.f32 %v948_v51, %v2160_v55  ;;  %v1457_v55 = vld [vmem:[%s2336_s4 + $0x60] sm:$0xff]  ;;  %v1006_v31 = vpop.permute.xlu0 %1005 }
 0x2d8   : > { %v957_v20 = vadd.f32 %v943_v17, %v2155_v54  ;;  %1724 = vmatprep.subr.bf16.mxu1 %v1723_v18  ;;  %1739 = vmatpush3.bf16.msra.mxu0 %v1723_v18  ;;  %v1456_v54 = vld [vmem:[%s2336_s4 + $0x58] sm:$0xff] }
 0x2d9   : > { %1726 = vmatpush3.bf16.msra.mxu1 %v1723_v18  ;;  %1740 = vmatprep.subr.bf16.mxu0 %v1897_v46 }
 0x2da   : > { %v1727_v49 = vpack.c.bf16 %v958_v19, %v957_v20 }
 0x2db   : > { %v1016_v45 = vpop.permute.xlu0 %1015 }
 0x2dc   : > { %1728 = vmatprep.subr.bf16.mxu1 %v1727_v49  ;;  %1742 = vmatpush3.bf16.msra.mxu0 %v1727_v49 }
 0x2dd   : > { %1730 = vmatpush3.bf16.msra.mxu1 %v1727_v49 }
 0x2de   : > { %1743 = vmatprep.subr.bf16.mxu1 %v1897_v46 }
 0x2df   : > { %1662 = vmatmul.mubr.msk.f32.vlgmr.msra.gmra.mrb[12].mxu0 %vm628_vm1, %v1171_v25  ;;  %v1026_v0 = vpop.permute.xlu0 %1025 }
 0x2e0   : > { %1634 = vmatmul.mubr.msk.f32.vlgmr.msra.gmra.mrb[8].mxu1 %vm628_vm1, %v1454_v50 }
 0x2e1   : > { %1636 = vmatprep.mubr.msk.f32.mxu1 %vm628_vm1, %v1455_v21 }
 0x2e3   : > { %v1322_v12 = vpop.permute.xlu0 %1321 }
 0x2e4   : > { %1637 = vmatmul.mubr.msk.f32.gmra.mrb[10].mxu1 %vm628_vm1, %v1456_v54 }
 0x2e5   : > { %1639 = vmatprep.mubr.msk.f32.mxu1 %vm628_vm1, %v1457_v55 }
 0x2e8   : > { %1640 = vmatmul.mubr.msk.f32.gmra.mrb[12].mxu1 %vm628_vm1, %v1458_v22 }
 0x2e9   : > { %1642 = vmatprep.mubr.msk.f32.mxu1 %vm628_vm1, %v1459_v23 }
 0x2ec   : > { %1643 = vmatmul.mubr.msk.f32.gmra.mrb[14].mxu1 %vm628_vm1, %v1460_v24 }
 0x2ed   : > { %1680 = vmatprep.mubr.msk.f32.mxu1 %vm1898_vm2, %v1899_v26 }
 0x3b2   : > { %v1241_v9 = vpop.f32.mrb[12].mxu0 }
 0x3b3   : > { %v1635_v30 = vpop.f32.mrb[8].mxu1  ;;  %v1663_v10 = vpop.f32.mrb[13].mxu0 }
 0x3b4   : > { %v1129_v32 = vadd.f32 %v1635_v30, %v1001_v27  ;;  %v1123_v33 = vpop.f32.mrb[9].mxu1 }
 0x3b5   : > { %v1124_v34 = vadd.f32 %v1123_v33, %v996_v28 }
 0x3b6   : > { %v1163_v35 = vmax.f32 %v1129_v32, 0.0 }
 0x3b7   : > { %v1162_v36 = vmax.f32 %v1124_v34, 0.0  ;;  %v1638_v37 = vpop.f32.mrb[10].mxu1 }
 0x3b8   : > { %v1139_v38 = vadd.f32 %v1638_v37, %v1011_v29  ;;  %v1133_v39 = vpop.f32.mrb[11].mxu1 }
 0x3b9   : > { %v1744_v42 = vpack.c.bf16 %v1163_v35, %v1162_v36  ;;  %v1134_v44 = vadd.f32 %v1133_v39, %v1006_v31 }
 0x3ba   : > { %v1165_v48 = vmax.f32 %v1139_v38, 0.0 }
 0x3bb   : > { %v1164_v52 = vmax.f32 %v1134_v44, 0.0  ;;  %v1641_v53 = vpop.f32.mrb[12].mxu1  ;;  %1745 = vmatpush3.bf16.msra.mxu1 %v1744_v42 }
 0x3bc   : > { %v1149_v56 = vadd.f32 %v1641_v53, %v1021_v40  ;;  %v1143_v57 = vpop.f32.mrb[13].mxu1  ;;  %1746 = vmatprep.subr.bf16.mxu1 %v1897_v46 }
 0x3bd   : > { %v1747_v58 = vpack.c.bf16 %v1165_v48, %v1164_v52  ;;  %v1144_v59 = vadd.f32 %v1143_v57, %v1016_v45 }
 0x3be   : > { %v1167_v60 = vmax.f32 %v1149_v56, 0.0 }
 0x3bf   : > { %v1166_v62 = vmax.f32 %v1144_v59, 0.0  ;;  %v1644_v63 = vpop.f32.mrb[14].mxu1  ;;  %1748 = vmatpush3.bf16.msra.mxu1 %v1747_v58 }
 0x3c0   : > { %v1159_v1 = vadd.f32 %v1644_v63, %v1031_v61  ;;  %v1153_v2 = vpop.f32.mrb[15].mxu1  ;;  %1749 = vmatprep.subr.bf16.mxu1 %v1897_v46 }
 0x3c1   : > { %v1750_v3 = vpack.c.bf16 %v1167_v60, %v1166_v62  ;;  %v1154_v4 = vadd.f32 %v1153_v2, %v1026_v0 }
 0x3c2   : > { %v1169_v5 = vmax.f32 %v1159_v1, 0.0 }
 0x3c3   : > { %v1168_v6 = vmax.f32 %v1154_v4, 0.0  ;;  %1751 = vmatpush3.bf16.msra.mxu1 %v1750_v3 }
 0x3c4   : > { %1752 = vmatprep.subr.bf16.mxu1 %v1897_v46  ;;  %v1327_v46 = vrot.slane %v1322_v12, %v1326_v43 }
 0x3c5   : > { %v1753_v7 = vpack.c.bf16 %v1169_v5, %v1168_v6 }
 0x3c7   : > { %1754 = vmatpush3.bf16.msra.mxu1 %v1753_v7 }
 0x3ca   : > { %1681 = vmatmul.mubr.msk.f32.vlgmr.msra.gmra.mrb[16].mxu1 %vm628_vm1, %v1170_v8 }
 0x49d   : > { %v1314_v13 = vpop.f32.mrb[16].mxu1 }
 0x49e   : > { %v1315_v14 = vadd.f32 %v1314_v13, %v1241_v9  ;;  %v1682_v15 = vpop.f32.mrb[17].mxu1 }
 0x4a0   : > { %v1328_v47 = vadd.f32 %v1327_v46, %v1315_v14 }
 0x4a2   : > { %1329 = vst [vmem:[%s413_s14] sm:$0x1] %v1328_v47 }
 0x4a3   : > { %1829 = shalt.err (!%p1826_p5)
}
 0x4a4   : > { %s1830_s23 = scalar_lea.hbm %s2285_s10, 16  ;;  %s1834_s13 = scalar_lea.hbm %s2343_s11, 32 }
 0x4a5   : > { %p1831_p6 = scmp.ne.s32.totalorder %s2285_s10, %s1830_s23  ;;  %p1835_p10 = scmp.lt.u32.totalorder %s2285_s10, %s2343_s11 }
 0x4a6   : > { %p1836_p11 = scmp.lt.u32.totalorder %s1834_s13, %s1830_s23  ;;  %p1838_p13 = scmp.lt.u32.totalorder %s1830_s23, %s2285_s10 }
 0x4a7   : > { %p1832_p7 = pnand %p1831_p6, %p2004_p4 }
 0x4a8   : > { %p1837_p12 = por %p1836_p11, %p1835_p10 }
 0x4a9   : > { %p1833_p9 = pneg %p1832_p7 }
 0x4aa   : > { %p1839_p0 = por %p1838_p13, %p1837_p12 }
 0x4ac   : > { %p1840_p1 = pnand %p1839_p0, %p1833_p9 }
 0x4ae   : > { %1843 = shalt.err (!%p1840_p1)
}
 0x4af   : > { %1755 = dma.vmem_to_hbm [thread:$0]  (%p2004_p4), %s2287_s15, 16, %s2285_s10, %s1331_s17  }
 0x4b0 PF: > { %p1761_p2 = scmp.ge.s32.totalorder %s1894_s24, 2  ;;  %s1356_s18 = sand.u32 1, %s1874_s19  }
 0x4b1   : > { %s1357_s25 = scalar_lea.sflag [#allocation5], %s1356_s18 }
 0x4b2   : > { %p1758_p3 = pnand %p1761_p2, %p2011_p8 }
 0x4b4   : > { %1869 = dma.done.wait (!%p1758_p3), %s1357_s25, 16  }
 0x4b5   : > { %1871 = vsyncadd (!%p1758_p3), %s1357_s25, 4294967280  ;;  %s26_s24 = sadd.s32 1, %s1894_s24   ;;  %s2351_s28 = sld [smem:[#allocation9_spill]] }
 0x4b6   : > { %p23_p5 = scmp.ge.s32.totalorder %s26_s24, 4   ;;  %s2352_s22 = sld [smem:[#allocation7_spill]] }
 0x4b7   : > { %s2353_s23 = sld [smem:[#allocation8_spill]]  ;;  %s2354_s19 = smov %s1878_s20 }
 0x4b8   : > { %s2355_s20 = smov %s1882_s21  ;;  %25 = sbr.rel (!%p23_p5) target bundleno = 7 (0x7), region = 104 }
 0x4bb   : > { %s2356_s21 = smov %s2351_s28 }
 0x4bf   :  { %1361 = vsyncpa [#allocation5], 1 }
 0x4c0   :  { %1363 = vsyncpa [#allocation5 + $0x1], 1 }

</bundles_post_ra>
